<compile_context>
chip_gen: v6e
topology: v6e:2x2x1
jax: 0.10.0
libtpu: 0.0.40
codegen_flags: <defaults>
</compile_context>

<pallas_src>
import jax
import jax.numpy as jnp
from jax.experimental import pallas as pl
from jax.experimental.pallas import tpu as pltpu


def _largest_divisor_leq(n, cap):
    best = 1
    for d in range(1, n + 1):
        if n % d == 0 and d <= cap:
            best = d
    return best


# ----------------------------------------------------------------------------
# Kernel 1: SpatialAttention maps for a stack of inputs.
#   grid = (S, C-blocks); running channel sum/max in VMEM scratch; 3x3 conv
#   (2 -> 1 channels, padding=1, no bias) as zero-pad + static slices; sigmoid.
# ----------------------------------------------------------------------------
def spatial_attention_maps(x_all, w_flat, *, block_bytes=2 << 20):
    """x_all: (S, C, H, W); w_flat: (18,) f32 flattened (1, 2, 3, 3) conv weight.

    Returns sigmoid(conv3x3([mean_c(x), max_c(x)])) as (S, H, W) float32.
    """
    S, C, H, W = x_all.shape
    cap = max(1, block_bytes // (H * W * 4))
    c_blk = _largest_divisor_leq(C, cap)          # channel block per grid step
    nc = C // c_blk
    inv_c = 1.0 / C

    def pad1(f):  # (H, W) -> (H+2, W+2), zero border (concat; no lax.pad needed)
        zr = jnp.zeros((1, W), f.dtype)
        f = jnp.concatenate([zr, f, zr], axis=0)
        zc = jnp.zeros((H + 2, 1), f.dtype)
        return jnp.concatenate([zc, f, zc], axis=1)

    def kernel(w_ref, x_ref, o_ref, sum_sc, max_sc):
        # w_ref: (18,) f32 scalar-prefetch (SMEM); x_ref: (c_blk, H, W) block;
        # o_ref: (H, W); sum_sc/max_sc: (H, W) f32 VMEM scratch.
        c_step = pl.program_id(1)
        x = x_ref[...].astype(jnp.float32)
        blk_sum = jnp.sum(x, axis=0)
        blk_max = jnp.max(x, axis=0)

        @pl.when(c_step == 0)
        def _():
            sum_sc[...] = blk_sum
            max_sc[...] = blk_max

        @pl.when(c_step != 0)
        def _():
            sum_sc[...] = sum_sc[...] + blk_sum
            max_sc[...] = jnp.maximum(max_sc[...], blk_max)

        @pl.when(c_step == nc - 1)
        def _():
            avg_p = pad1(sum_sc[...] * inv_c)     # channel-mean feature, padded
            max_p = pad1(max_sc[...])             # channel-max feature, padded
            acc = jnp.zeros((H, W), jnp.float32)
            # 3x3 cross-correlation (PyTorch Conv2d semantics), fully unrolled.
            for ki in range(3):
                for kj in range(3):
                    tap_a = avg_p[ki:ki + H, kj:kj + W]
                    tap_m = max_p[ki:ki + H, kj:kj + W]
                    acc = (acc
                           + w_ref[ki * 3 + kj] * tap_a
                           + w_ref[9 + ki * 3 + kj] * tap_m)
            o_ref[...] = jax.nn.sigmoid(acc)

    return pl.pallas_call(
        kernel,
        out_shape=jax.ShapeDtypeStruct((S, H, W), jnp.float32),
        grid_spec=pltpu.PrefetchScalarGridSpec(
            num_scalar_prefetch=1,
            grid=(S, nc),
            in_specs=[pl.BlockSpec((None, c_blk, H, W),
                                   lambda s, c, w: (s, c, 0, 0))],
            out_specs=pl.BlockSpec((None, H, W), lambda s, c, w: (s, 0, 0)),
            scratch_shapes=[pltpu.VMEM((H, W), jnp.float32),
                            pltpu.VMEM((H, W), jnp.float32)]),
        compiler_params=pltpu.CompilerParams(
            dimension_semantics=("parallel", "arbitrary")),
    )(w_flat, x_all)


# ----------------------------------------------------------------------------
# Kernel 2: the exchange (tiled, lane-dense, pipelined elementwise multiply).
# ----------------------------------------------------------------------------
def _exchange_kernel(avg_ref, a1_ref, a2_ref, x1_ref, x2_ref, o1_ref, o2_ref):
    # avg_ref: (2,) f32 scalar prefetch in SMEM: [mean(a1), mean(a2)]
    # a*_ref : (1, HW) attention-map row for this batch element
    # x*_ref / o*_ref: (c_blk, HW) channel block
    a1 = a1_ref[...]
    a2 = a2_ref[...]
    ex1 = jnp.where(a1 < avg_ref[0], a2, a1)      # exchange_map1
    ex2 = jnp.where(a2 < avg_ref[1], a1, a2)      # exchange_map2
    w1 = ex1 + a1                                 # (1, HW) -> broadcasts over C
    w2 = ex2 + a2
    o1_ref[...] = (x1_ref[...] * w1).astype(o1_ref.dtype)
    o2_ref[...] = (x2_ref[...] * w2).astype(o2_ref.dtype)


def _pick_exchange_c_block(C, HW, *, block_bytes=1 << 20):
    cap = max(1, block_bytes // (HW * 4))
    if C <= cap:
        return C                                   # full-C block (last-two dims = full)
    best = None
    for d in range(1, C + 1):
        # keep the second-to-last block dim a multiple of 8 (TPU tiling rule)
        if C % d == 0 and d % 8 == 0 and d <= cap:
            best = d
    return best if best is not None else C         # fallback: full C (still correct)


def spatial_exchange(x1, x2, conv_w):
    """x1, x2: (B, C, H, W); conv_w: (1, 2, 3, 3) SpatialAttention conv weight."""
    B, C, H, W = x1.shape
    HW = H * W
    w_flat = conv_w.reshape(-1).astype(jnp.float32)            # (18,)

    # Single attention pallas_call over both inputs (stacked on batch).
    a_all = spatial_attention_maps(jnp.concatenate([x1, x2], axis=0), w_flat)
    a1, a2 = a_all[:B], a_all[B:]                               # (B, H, W) each

    # Global means computed outside the kernel on the tiny maps -> SMEM scalars.
    avg = jnp.stack([jnp.mean(a1), jnp.mean(a2)]).astype(jnp.float32)   # (2,)

    # Lane-dense layouts: last block dim is the full H*W axis.
    a1r = a1.reshape(B, 1, HW)
    a2r = a2.reshape(B, 1, HW)
    x1r = x1.reshape(B, C, HW)
    x2r = x2.reshape(B, C, HW)

    c_blk = _pick_exchange_c_block(C, HW)
    nc = C // c_blk
    x_spec = pl.BlockSpec((None, c_blk, HW), lambda b, c, avg: (b, c, 0))
    a_spec = pl.BlockSpec((None, 1, HW), lambda b, c, avg: (b, 0, 0))

    o1, o2 = pl.pallas_call(
        _exchange_kernel,
        out_shape=(jax.ShapeDtypeStruct((B, C, HW), x1.dtype),
                   jax.ShapeDtypeStruct((B, C, HW), x2.dtype)),
        grid_spec=pltpu.PrefetchScalarGridSpec(
            num_scalar_prefetch=1,
            grid=(B, nc),
            in_specs=[a_spec, a_spec, x_spec, x_spec],
            out_specs=(x_spec, x_spec),
        ),
        compiler_params=pltpu.CompilerParams(
            dimension_semantics=("parallel", "parallel")),
    )(avg, a1r, a2r, x1r, x2r)
    return o1.reshape(B, C, H, W), o2.reshape(B, C, H, W)


# ----------------------------------------------------------------------------
# Pure-JAX reference (mirrors the PyTorch module) for a correctness check.
# ----------------------------------------------------------------------------
def _reference(x1, x2, w):
    def sam(x):
        avg = jnp.mean(x, axis=1, keepdims=True)
        mx = jnp.max(x, axis=1, keepdims=True)
        feats = jnp.concatenate([avg, mx], axis=1)
        out = jax.lax.conv_general_dilated(
            feats, w, window_strides=(1, 1), padding=((1, 1), (1, 1)),
            dimension_numbers=("NCHW", "OIHW", "NCHW"),
            precision=jax.lax.Precision.HIGHEST)
        return jax.nn.sigmoid(out)                               # (B, 1, H, W)
    a1, a2 = sam(x1), sam(x2)
    m1, m2 = jnp.mean(a1), jnp.mean(a2)
    e1 = jnp.where(a1 < m1, a2, a1)
    e2 = jnp.where(a2 < m2, a1, a2)
    return x1 * (e1 + a1), x2 * (e2 + a2)


if __name__ == "__main__":
    B, C, H, W = 2, 4, 16, 16
    key = jax.random.PRNGKey(0)
    k1, k2, kw = jax.random.split(key, 3)
    x1 = jax.random.normal(k1, (B, C, H, W), jnp.float32)
    x2 = jax.random.normal(k2, (B, C, H, W), jnp.float32)

    # Deterministic conv1 weight, shape (out=1, in=2, kH=3, kW=3), no bias.
    fan_in = 2 * 3 * 3
    bound = 1.0 / (fan_in ** 0.5)
    conv_w = jax.random.uniform(kw, (1, 2, 3, 3), jnp.float32, -bound, bound)

    out1, out2 = jax.jit(spatial_exchange)(x1, x2, conv_w)
    jax.block_until_ready((out1, out2))

    ref1, ref2 = _reference(x1, x2, conv_w)
    assert out1.shape == x1.shape and out2.shape == x2.shape
    assert jnp.allclose(out1, ref1, atol=1e-3, rtol=1e-3)
    assert jnp.allclose(out2, ref2, atol=1e-3, rtol=1e-3)
    print("KERNEL_OK")
</pallas_src>

<mosaic_0001>
module attributes {stable_mosaic.version = 11 : i64} {
  func.func @kernel(%arg0: i32, %arg1: i32, %arg2: memref<18xf32, #tpu.memory_space<smem>>, %arg3: memref<1x4x16x16xf32, #tpu.memory_space<vmem>>, %arg4: memref<1x16x16xf32, #tpu.memory_space<vmem>>, %arg5: memref<16x16xf32, #tpu.memory_space<vmem>>, %arg6: memref<16x16xf32, #tpu.memory_space<vmem>>) attributes {dimension_semantics = [#tpu.dimension_semantics<parallel>, #tpu.dimension_semantics<arbitrary>], iteration_bounds = array<i64: 4, 1>, scalar_prefetch = 1 : i64, scratch_operands = 2 : i64, tpu.core_type = #tpu.core_type<tc>, window_params = [{transform_indices = @transform_0, window_bounds = array<i64: 1, 4, 16, 16>}, {transform_indices = @transform_1, window_bounds = array<i64: 1, 16, 16>}]} {
    %c0 = arith.constant 0 : index
    %c0_0 = arith.constant 0 : index
    %c0_1 = arith.constant 0 : index
    %c0_2 = arith.constant 0 : index
    %0 = vector.load %arg3[%c0, %c0_0, %c0_1, %c0_2] : memref<1x4x16x16xf32, #tpu.memory_space<vmem>>, vector<1x4x16x16xf32>
    %1 = vector.shape_cast %0 : vector<1x4x16x16xf32> to vector<4x16x16xf32>
    %cst = arith.constant dense<0.000000e+00> : vector<16x16xf32>
    %2 = vector.multi_reduction <add>, %1, %cst [0] : vector<4x16x16xf32> to vector<16x16xf32>
    %cst_3 = arith.constant dense<0xFF800000> : vector<16x16xf32>
    %3 = vector.multi_reduction <maximumf>, %1, %cst_3 [0] : vector<4x16x16xf32> to vector<16x16xf32>
    %c0_i32 = arith.constant 0 : i32
    %4 = arith.cmpi eq, %arg1, %c0_i32 : i32
    %5 = arith.extui %4 : i1 to i32
    %c0_i32_4 = arith.constant 0 : i32
    %6 = arith.cmpi ne, %5, %c0_i32_4 : i32
    scf.if %6 {
      %c0_9 = arith.constant 0 : index
      %c0_10 = arith.constant 0 : index
      %13 = vector.load %arg5[%c0_9, %c0_10] : memref<16x16xf32, #tpu.memory_space<vmem>>, vector<16x16xf32>
      tpu.vector_store %arg5[%c0_9, %c0_10], %2 {strides = array<i32>} : memref<16x16xf32, #tpu.memory_space<vmem>>, vector<16x16xf32>,
      %c0_11 = arith.constant 0 : index
      %c0_12 = arith.constant 0 : index
      %14 = vector.load %arg6[%c0_11, %c0_12] : memref<16x16xf32, #tpu.memory_space<vmem>>, vector<16x16xf32>
      tpu.vector_store %arg6[%c0_11, %c0_12], %3 {strides = array<i32>} : memref<16x16xf32, #tpu.memory_space<vmem>>, vector<16x16xf32>,
    } else {
    }
    %c0_i32_5 = arith.constant 0 : i32
    %7 = arith.cmpi ne, %arg1, %c0_i32_5 : i32
    %8 = arith.extui %7 : i1 to i32
    %c0_i32_6 = arith.constant 0 : i32
    %9 = arith.cmpi ne, %8, %c0_i32_6 : i32
    scf.if %9 {
      %c0_9 = arith.constant 0 : index
      %c0_10 = arith.constant 0 : index
      %13 = vector.load %arg5[%c0_9, %c0_10] : memref<16x16xf32, #tpu.memory_space<vmem>>, vector<16x16xf32>
      %14 = arith.addf %13, %2 : vector<16x16xf32>
      %c0_11 = arith.constant 0 : index
      %c0_12 = arith.constant 0 : index
      %15 = vector.load %arg5[%c0_11, %c0_12] : memref<16x16xf32, #tpu.memory_space<vmem>>, vector<16x16xf32>
      tpu.vector_store %arg5[%c0_11, %c0_12], %14 {strides = array<i32>} : memref<16x16xf32, #tpu.memory_space<vmem>>, vector<16x16xf32>,
      %c0_13 = arith.constant 0 : index
      %c0_14 = arith.constant 0 : index
      %16 = vector.load %arg6[%c0_13, %c0_14] : memref<16x16xf32, #tpu.memory_space<vmem>>, vector<16x16xf32>
      %17 = arith.maximumf %16, %3 : vector<16x16xf32>
      %c0_15 = arith.constant 0 : index
      %c0_16 = arith.constant 0 : index
      %18 = vector.load %arg6[%c0_15, %c0_16] : memref<16x16xf32, #tpu.memory_space<vmem>>, vector<16x16xf32>
      tpu.vector_store %arg6[%c0_15, %c0_16], %17 {strides = array<i32>} : memref<16x16xf32, #tpu.memory_space<vmem>>, vector<16x16xf32>,
    } else {
    }
    %c0_i32_7 = arith.constant 0 : i32
    %10 = arith.cmpi eq, %arg1, %c0_i32_7 : i32
    %11 = arith.extui %10 : i1 to i32
    %c0_i32_8 = arith.constant 0 : i32
    %12 = arith.cmpi ne, %11, %c0_i32_8 : i32
    scf.if %12 {
      %c0_9 = arith.constant 0 : index
      %c0_10 = arith.constant 0 : index
      %13 = vector.load %arg5[%c0_9, %c0_10] : memref<16x16xf32, #tpu.memory_space<vmem>>, vector<16x16xf32>
      %cst_11 = arith.constant 2.500000e-01 : f32
      %14 = vector.broadcast %cst_11 : f32 to vector<16x16xf32>
      %15 = arith.mulf %13, %14 : vector<16x16xf32>
      %cst_12 = arith.constant 0.000000e+00 : f32
      %16 = vector.broadcast %cst_12 : f32 to vector<1x16xf32>
      %17 = tpu.concatenate %16, %15, %16 in 0 : vector<1x16xf32>, vector<16x16xf32>, vector<1x16xf32> -> vector<18x16xf32>
      %cst_13 = arith.constant 0.000000e+00 : f32
      %18 = vector.broadcast %cst_13 : f32 to vector<18x1xf32>
      %19 = tpu.concatenate %18, %17, %18 in 1 : vector<18x1xf32>, vector<18x16xf32>, vector<18x1xf32> -> vector<18x18xf32>
      %c0_14 = arith.constant 0 : index
      %c0_15 = arith.constant 0 : index
      %20 = vector.load %arg6[%c0_14, %c0_15] : memref<16x16xf32, #tpu.memory_space<vmem>>, vector<16x16xf32>
      %cst_16 = arith.constant 0.000000e+00 : f32
      %21 = vector.broadcast %cst_16 : f32 to vector<1x16xf32>
      %22 = tpu.concatenate %21, %20, %21 in 0 : vector<1x16xf32>, vector<16x16xf32>, vector<1x16xf32> -> vector<18x16xf32>
      %cst_17 = arith.constant 0.000000e+00 : f32
      %23 = vector.broadcast %cst_17 : f32 to vector<18x1xf32>
      %24 = tpu.concatenate %23, %22, %23 in 1 : vector<18x1xf32>, vector<18x16xf32>, vector<18x1xf32> -> vector<18x18xf32>
      %cst_18 = arith.constant 0.000000e+00 : f32
      %25 = vector.broadcast %cst_18 : f32 to vector<16x16xf32>
      %26 = vector.extract_strided_slice %19 {offsets = [0, 0], sizes = [16, 16], strides = [1, 1]} : vector<18x18xf32> to vector<16x16xf32>
      %27 = vector.extract_strided_slice %24 {offsets = [0, 0], sizes = [16, 16], strides = [1, 1]} : vector<18x18xf32> to vector<16x16xf32>
      %c0_19 = arith.constant 0 : index
      %28 = memref.load %arg2[%c0_19] : memref<18xf32, #tpu.memory_space<smem>>
      %29 = vector.broadcast %28 : f32 to vector<16x16xf32>
      %30 = arith.mulf %29, %26 : vector<16x16xf32>
      %31 = arith.addf %25, %30 : vector<16x16xf32>
      %c9 = arith.constant 9 : index
      %32 = memref.load %arg2[%c9] : memref<18xf32, #tpu.memory_space<smem>>
      %33 = vector.broadcast %32 : f32 to vector<16x16xf32>
      %34 = arith.mulf %33, %27 : vector<16x16xf32>
      %35 = arith.addf %31, %34 : vector<16x16xf32>
      %36 = vector.extract_strided_slice %19 {offsets = [0, 1], sizes = [16, 16], strides = [1, 1]} : vector<18x18xf32> to vector<16x16xf32>
      %37 = vector.extract_strided_slice %24 {offsets = [0, 1], sizes = [16, 16], strides = [1, 1]} : vector<18x18xf32> to vector<16x16xf32>
      %c1 = arith.constant 1 : index
      %38 = memref.load %arg2[%c1] : memref<18xf32, #tpu.memory_space<smem>>
      %39 = vector.broadcast %38 : f32 to vector<16x16xf32>
      %40 = arith.mulf %39, %36 : vector<16x16xf32>
      %41 = arith.addf %35, %40 : vector<16x16xf32>
      %c10 = arith.constant 10 : index
      %42 = memref.load %arg2[%c10] : memref<18xf32, #tpu.memory_space<smem>>
      %43 = vector.broadcast %42 : f32 to vector<16x16xf32>
      %44 = arith.mulf %43, %37 : vector<16x16xf32>
      %45 = arith.addf %41, %44 : vector<16x16xf32>
      %46 = vector.extract_strided_slice %19 {offsets = [0, 2], sizes = [16, 16], strides = [1, 1]} : vector<18x18xf32> to vector<16x16xf32>
      %47 = vector.extract_strided_slice %24 {offsets = [0, 2], sizes = [16, 16], strides = [1, 1]} : vector<18x18xf32> to vector<16x16xf32>
      %c2 = arith.constant 2 : index
      %48 = memref.load %arg2[%c2] : memref<18xf32, #tpu.memory_space<smem>>
      %49 = vector.broadcast %48 : f32 to vector<16x16xf32>
      %50 = arith.mulf %49, %46 : vector<16x16xf32>
      %51 = arith.addf %45, %50 : vector<16x16xf32>
      %c11 = arith.constant 11 : index
      %52 = memref.load %arg2[%c11] : memref<18xf32, #tpu.memory_space<smem>>
      %53 = vector.broadcast %52 : f32 to vector<16x16xf32>
      %54 = arith.mulf %53, %47 : vector<16x16xf32>
      %55 = arith.addf %51, %54 : vector<16x16xf32>
      %56 = vector.extract_strided_slice %19 {offsets = [1, 0], sizes = [16, 16], strides = [1, 1]} : vector<18x18xf32> to vector<16x16xf32>
      %57 = vector.extract_strided_slice %24 {offsets = [1, 0], sizes = [16, 16], strides = [1, 1]} : vector<18x18xf32> to vector<16x16xf32>
      %c3 = arith.constant 3 : index
      %58 = memref.load %arg2[%c3] : memref<18xf32, #tpu.memory_space<smem>>
      %59 = vector.broadcast %58 : f32 to vector<16x16xf32>
      %60 = arith.mulf %59, %56 : vector<16x16xf32>
      %61 = arith.addf %55, %60 : vector<16x16xf32>
      %c12 = arith.constant 12 : index
      %62 = memref.load %arg2[%c12] : memref<18xf32, #tpu.memory_space<smem>>
      %63 = vector.broadcast %62 : f32 to vector<16x16xf32>
      %64 = arith.mulf %63, %57 : vector<16x16xf32>
      %65 = arith.addf %61, %64 : vector<16x16xf32>
      %66 = vector.extract_strided_slice %19 {offsets = [1, 1], sizes = [16, 16], strides = [1, 1]} : vector<18x18xf32> to vector<16x16xf32>
      %67 = vector.extract_strided_slice %24 {offsets = [1, 1], sizes = [16, 16], strides = [1, 1]} : vector<18x18xf32> to vector<16x16xf32>
      %c4 = arith.constant 4 : index
      %68 = memref.load %arg2[%c4] : memref<18xf32, #tpu.memory_space<smem>>
      %69 = vector.broadcast %68 : f32 to vector<16x16xf32>
      %70 = arith.mulf %69, %66 : vector<16x16xf32>
      %71 = arith.addf %65, %70 : vector<16x16xf32>
      %c13 = arith.constant 13 : index
      %72 = memref.load %arg2[%c13] : memref<18xf32, #tpu.memory_space<smem>>
      %73 = vector.broadcast %72 : f32 to vector<16x16xf32>
      %74 = arith.mulf %73, %67 : vector<16x16xf32>
      %75 = arith.addf %71, %74 : vector<16x16xf32>
      %76 = vector.extract_strided_slice %19 {offsets = [1, 2], sizes = [16, 16], strides = [1, 1]} : vector<18x18xf32> to vector<16x16xf32>
      %77 = vector.extract_strided_slice %24 {offsets = [1, 2], sizes = [16, 16], strides = [1, 1]} : vector<18x18xf32> to vector<16x16xf32>
      %c5 = arith.constant 5 : index
      %78 = memref.load %arg2[%c5] : memref<18xf32, #tpu.memory_space<smem>>
      %79 = vector.broadcast %78 : f32 to vector<16x16xf32>
      %80 = arith.mulf %79, %76 : vector<16x16xf32>
      %81 = arith.addf %75, %80 : vector<16x16xf32>
      %c14 = arith.constant 14 : index
      %82 = memref.load %arg2[%c14] : memref<18xf32, #tpu.memory_space<smem>>
      %83 = vector.broadcast %82 : f32 to vector<16x16xf32>
      %84 = arith.mulf %83, %77 : vector<16x16xf32>
      %85 = arith.addf %81, %84 : vector<16x16xf32>
      %86 = vector.extract_strided_slice %19 {offsets = [2, 0], sizes = [16, 16], strides = [1, 1]} : vector<18x18xf32> to vector<16x16xf32>
      %87 = vector.extract_strided_slice %24 {offsets = [2, 0], sizes = [16, 16], strides = [1, 1]} : vector<18x18xf32> to vector<16x16xf32>
      %c6 = arith.constant 6 : index
      %88 = memref.load %arg2[%c6] : memref<18xf32, #tpu.memory_space<smem>>
      %89 = vector.broadcast %88 : f32 to vector<16x16xf32>
      %90 = arith.mulf %89, %86 : vector<16x16xf32>
      %91 = arith.addf %85, %90 : vector<16x16xf32>
      %c15 = arith.constant 15 : index
      %92 = memref.load %arg2[%c15] : memref<18xf32, #tpu.memory_space<smem>>
      %93 = vector.broadcast %92 : f32 to vector<16x16xf32>
      %94 = arith.mulf %93, %87 : vector<16x16xf32>
      %95 = arith.addf %91, %94 : vector<16x16xf32>
      %96 = vector.extract_strided_slice %19 {offsets = [2, 1], sizes = [16, 16], strides = [1, 1]} : vector<18x18xf32> to vector<16x16xf32>
      %97 = vector.extract_strided_slice %24 {offsets = [2, 1], sizes = [16, 16], strides = [1, 1]} : vector<18x18xf32> to vector<16x16xf32>
      %c7 = arith.constant 7 : index
      %98 = memref.load %arg2[%c7] : memref<18xf32, #tpu.memory_space<smem>>
      %99 = vector.broadcast %98 : f32 to vector<16x16xf32>
      %100 = arith.mulf %99, %96 : vector<16x16xf32>
      %101 = arith.addf %95, %100 : vector<16x16xf32>
      %c16 = arith.constant 16 : index
      %102 = memref.load %arg2[%c16] : memref<18xf32, #tpu.memory_space<smem>>
      %103 = vector.broadcast %102 : f32 to vector<16x16xf32>
      %104 = arith.mulf %103, %97 : vector<16x16xf32>
      %105 = arith.addf %101, %104 : vector<16x16xf32>
      %106 = vector.extract_strided_slice %19 {offsets = [2, 2], sizes = [16, 16], strides = [1, 1]} : vector<18x18xf32> to vector<16x16xf32>
      %107 = vector.extract_strided_slice %24 {offsets = [2, 2], sizes = [16, 16], strides = [1, 1]} : vector<18x18xf32> to vector<16x16xf32>
      %c8 = arith.constant 8 : index
      %108 = memref.load %arg2[%c8] : memref<18xf32, #tpu.memory_space<smem>>
      %109 = vector.broadcast %108 : f32 to vector<16x16xf32>
      %110 = arith.mulf %109, %106 : vector<16x16xf32>
      %111 = arith.addf %105, %110 : vector<16x16xf32>
      %c17 = arith.constant 17 : index
      %112 = memref.load %arg2[%c17] : memref<18xf32, #tpu.memory_space<smem>>
      %113 = vector.broadcast %112 : f32 to vector<16x16xf32>
      %114 = arith.mulf %113, %107 : vector<16x16xf32>
      %115 = arith.addf %111, %114 : vector<16x16xf32>
      %116 = arith.negf %115 : vector<16x16xf32>
      %117 = math.exp %116 : vector<16x16xf32>
      %cst_20 = arith.constant 1.000000e+00 : f32
      %118 = vector.broadcast %cst_20 : f32 to vector<16x16xf32>
      %119 = arith.addf %118, %117 : vector<16x16xf32>
      %120 = arith.divf %118, %119 : vector<16x16xf32>
      %c0_21 = arith.constant 0 : index
      %c0_22 = arith.constant 0 : index
      %c0_23 = arith.constant 0 : index
      %121 = vector.load %arg4[%c0_21, %c0_22, %c0_23] : memref<1x16x16xf32, #tpu.memory_space<vmem>>, vector<1x16x16xf32>
      %122 = vector.shape_cast %121 : vector<1x16x16xf32> to vector<16x16xf32>
      %123 = vector.shape_cast %120 : vector<16x16xf32> to vector<1x16x16xf32>
      tpu.vector_store %arg4[%c0_21, %c0_22, %c0_23], %123 {strides = array<i32>} : memref<1x16x16xf32, #tpu.memory_space<vmem>>, vector<1x16x16xf32>,
    } else {
    }
    return
  }
  func.func @transform_0(%arg0: i32, %arg1: i32, %arg2: memref<18xf32, #tpu.memory_space<smem>>) -> (i32, i32, i32, i32) {
    %c0_i32 = arith.constant 0 : i32
    %c0_i32_0 = arith.constant 0 : i32
    %c0_i32_1 = arith.constant 0 : i32
    return %arg0, %arg1, %c0_i32, %c0_i32_0 : i32, i32, i32, i32
  }
  func.func @transform_1(%arg0: i32, %arg1: i32, %arg2: memref<18xf32, #tpu.memory_space<smem>>) -> (i32, i32, i32) {
    %c0_i32 = arith.constant 0 : i32
    %c0_i32_0 = arith.constant 0 : i32
    %c0_i32_1 = arith.constant 0 : i32
    return %arg0, %c0_i32, %c0_i32_0 : i32, i32, i32
  }
}

module attributes {stable_mosaic.version = 11 : i64} {
  func.func @_exchange_kernel(%arg0: i32, %arg1: i32, %arg2: memref<2xf32, #tpu.memory_space<smem>>, %arg3: memref<1x1x256xf32, #tpu.memory_space<vmem>>, %arg4: memref<1x1x256xf32, #tpu.memory_space<vmem>>, %arg5: memref<1x4x256xf32, #tpu.memory_space<vmem>>, %arg6: memref<1x4x256xf32, #tpu.memory_space<vmem>>, %arg7: memref<1x4x256xf32, #tpu.memory_space<vmem>>, %arg8: memref<1x4x256xf32, #tpu.memory_space<vmem>>) attributes {dimension_semantics = [#tpu.dimension_semantics<parallel>, #tpu.dimension_semantics<parallel>], iteration_bounds = array<i64: 2, 1>, scalar_prefetch = 1 : i64, scratch_operands = 0 : i64, tpu.core_type = #tpu.core_type<tc>, window_params = [{transform_indices = @transform_0, window_bounds = array<i64: 1, 1, 256>}, {transform_indices = @transform_1, window_bounds = array<i64: 1, 1, 256>}, {transform_indices = @transform_2, window_bounds = array<i64: 1, 4, 256>}, {transform_indices = @transform_3, window_bounds = array<i64: 1, 4, 256>}, {transform_indices = @transform_4, window_bounds = array<i64: 1, 4, 256>}, {transform_indices = @transform_5, window_bounds = array<i64: 1, 4, 256>}]} {
    %c0 = arith.constant 0 : index
    %c0_0 = arith.constant 0 : index
    %c0_1 = arith.constant 0 : index
    %0 = vector.load %arg3[%c0, %c0_0, %c0_1] : memref<1x1x256xf32, #tpu.memory_space<vmem>>, vector<1x1x256xf32>
    %1 = vector.shape_cast %0 : vector<1x1x256xf32> to vector<1x256xf32>
    %c0_2 = arith.constant 0 : index
    %c0_3 = arith.constant 0 : index
    %c0_4 = arith.constant 0 : index
    %2 = vector.load %arg4[%c0_2, %c0_3, %c0_4] : memref<1x1x256xf32, #tpu.memory_space<vmem>>, vector<1x1x256xf32>
    %3 = vector.shape_cast %2 : vector<1x1x256xf32> to vector<1x256xf32>
    %c0_5 = arith.constant 0 : index
    %4 = memref.load %arg2[%c0_5] : memref<2xf32, #tpu.memory_space<smem>>
    %5 = vector.broadcast %4 : f32 to vector<1x256xf32>
    %6 = arith.cmpf olt, %1, %5 : vector<1x256xf32>
    %7 = arith.select %6, %3, %1 : vector<1x256xi1>, vector<1x256xf32>
    %c1 = arith.constant 1 : index
    %8 = memref.load %arg2[%c1] : memref<2xf32, #tpu.memory_space<smem>>
    %9 = vector.broadcast %8 : f32 to vector<1x256xf32>
    %10 = arith.cmpf olt, %3, %9 : vector<1x256xf32>
    %11 = arith.select %10, %1, %3 : vector<1x256xi1>, vector<1x256xf32>
    %12 = arith.addf %7, %1 : vector<1x256xf32>
    %13 = arith.addf %11, %3 : vector<1x256xf32>
    %c0_6 = arith.constant 0 : index
    %c0_7 = arith.constant 0 : index
    %c0_8 = arith.constant 0 : index
    %14 = vector.load %arg5[%c0_6, %c0_7, %c0_8] : memref<1x4x256xf32, #tpu.memory_space<vmem>>, vector<1x4x256xf32>
    %15 = vector.shape_cast %14 : vector<1x4x256xf32> to vector<4x256xf32>
    %16 = vector.broadcast %12 : vector<1x256xf32> to vector<4x256xf32>
    %17 = arith.mulf %15, %16 : vector<4x256xf32>
    %c0_9 = arith.constant 0 : index
    %c0_10 = arith.constant 0 : index
    %c0_11 = arith.constant 0 : index
    %18 = vector.load %arg7[%c0_9, %c0_10, %c0_11] : memref<1x4x256xf32, #tpu.memory_space<vmem>>, vector<1x4x256xf32>
    %19 = vector.shape_cast %18 : vector<1x4x256xf32> to vector<4x256xf32>
    %20 = vector.shape_cast %17 : vector<4x256xf32> to vector<1x4x256xf32>
    tpu.vector_store %arg7[%c0_9, %c0_10, %c0_11], %20 {strides = array<i32>} : memref<1x4x256xf32, #tpu.memory_space<vmem>>, vector<1x4x256xf32>,
    %c0_12 = arith.constant 0 : index
    %c0_13 = arith.constant 0 : index
    %c0_14 = arith.constant 0 : index
    %21 = vector.load %arg6[%c0_12, %c0_13, %c0_14] : memref<1x4x256xf32, #tpu.memory_space<vmem>>, vector<1x4x256xf32>
    %22 = vector.shape_cast %21 : vector<1x4x256xf32> to vector<4x256xf32>
    %23 = vector.broadcast %13 : vector<1x256xf32> to vector<4x256xf32>
    %24 = arith.mulf %22, %23 : vector<4x256xf32>
    %c0_15 = arith.constant 0 : index
    %c0_16 = arith.constant 0 : index
    %c0_17 = arith.constant 0 : index
    %25 = vector.load %arg8[%c0_15, %c0_16, %c0_17] : memref<1x4x256xf32, #tpu.memory_space<vmem>>, vector<1x4x256xf32>
    %26 = vector.shape_cast %25 : vector<1x4x256xf32> to vector<4x256xf32>
    %27 = vector.shape_cast %24 : vector<4x256xf32> to vector<1x4x256xf32>
    tpu.vector_store %arg8[%c0_15, %c0_16, %c0_17], %27 {strides = array<i32>} : memref<1x4x256xf32, #tpu.memory_space<vmem>>, vector<1x4x256xf32>,
    return
  }
  func.func @transform_0(%arg0: i32, %arg1: i32, %arg2: memref<2xf32, #tpu.memory_space<smem>>) -> (i32, i32, i32) {
    %c0_i32 = arith.constant 0 : i32
    %c0_i32_0 = arith.constant 0 : i32
    %c0_i32_1 = arith.constant 0 : i32
    return %arg0, %c0_i32, %c0_i32_0 : i32, i32, i32
  }
  func.func @transform_1(%arg0: i32, %arg1: i32, %arg2: memref<2xf32, #tpu.memory_space<smem>>) -> (i32, i32, i32) {
    %c0_i32 = arith.constant 0 : i32
    %c0_i32_0 = arith.constant 0 : i32
    %c0_i32_1 = arith.constant 0 : i32
    return %arg0, %c0_i32, %c0_i32_0 : i32, i32, i32
  }
  func.func @transform_2(%arg0: i32, %arg1: i32, %arg2: memref<2xf32, #tpu.memory_space<smem>>) -> (i32, i32, i32) {
    %c0_i32 = arith.constant 0 : i32
    %c0_i32_0 = arith.constant 0 : i32
    return %arg0, %arg1, %c0_i32 : i32, i32, i32
  }
  func.func @transform_3(%arg0: i32, %arg1: i32, %arg2: memref<2xf32, #tpu.memory_space<smem>>) -> (i32, i32, i32) {
    %c0_i32 = arith.constant 0 : i32
    %c0_i32_0 = arith.constant 0 : i32
    return %arg0, %arg1, %c0_i32 : i32, i32, i32
  }
  func.func @transform_4(%arg0: i32, %arg1: i32, %arg2: memref<2xf32, #tpu.memory_space<smem>>) -> (i32, i32, i32) {
    %c0_i32 = arith.constant 0 : i32
    %c0_i32_0 = arith.constant 0 : i32
    return %arg0, %arg1, %c0_i32 : i32, i32, i32
  }
  func.func @transform_5(%arg0: i32, %arg1: i32, %arg2: memref<2xf32, #tpu.memory_space<smem>>) -> (i32, i32, i32) {
    %c0_i32 = arith.constant 0 : i32
    %c0_i32_0 = arith.constant 0 : i32
    return %arg0, %arg1, %c0_i32 : i32, i32, i32
  }
}

</mosaic_0001>

<bundles_post_ra>
// kernel: spatial_exchange.3
= control target key start
LH: loop header
LB: loop body
LE: loop exit
PB: predicated region body
PF: predicated region fallthrough
CT: control target
= control target key end

     0   :  { %s758_s0 = inlined_call_operand.vmem [shape: f32[2], index: 0, kind: input, shape index: {}]   ;;  %s759_s1 = inlined_call_operand.vmem [shape: f32[2,1,256], index: 1, kind: input, shape index: {}]   ;;  %s760_s2 = inlined_call_operand.vmem [shape: f32[2,1,256], index: 2, kind: input, shape index: {}]   ;;  %s761_s3 = inlined_call_operand.vmem [shape: f32[2,4,256], index: 3, kind: input, shape index: {}]   ;;  %s762_s4 = inlined_call_operand.vmem [shape: f32[2,4,256], index: 4, kind: input, shape index: {}]   ;;  %s763_s5 = inlined_call_operand.vmem [shape: f32[2,4,256], index: 5, kind: output, shape index: {0}]   ;;  %s764_s6 = inlined_call_operand.vmem [shape: f32[2,4,256], index: 6, kind: output, shape index: {1}]  }
   0x1   :  { %s12_s23 = sshll.u32 %s758_s0, 4  ;;  %s13_s23 = int_to_ptr.vmem [resolvable:$true] %s12_s23 }
   0x2   :  { %s636_s24 = scalar_lea.vmem %s13_s23, 16  ;;  %p641_p1 = scmp.lt.s32.totalorder %s13_s23, %s13_s23 }
   0x3   :  { %p637_p0 = scmp.ne.s32.totalorder %s13_s23, %s636_s24  ;;  %p642_p2 = scmp.lt.s32.totalorder %s636_s24, %s636_s24 }
   0x5   :  { %p643_p3 = por %p642_p2, %p641_p1 }
   0x7   :  { %p644_p4 = pnand %p643_p3, %p637_p0 }
   0x9   :  { %647 = shalt.err (!%p644_p4)  }
   0xa   :  { %s674_s25 = smov [#allocation3]  }
   0xb   :  { %15 = dma.vmem_to_smem %s13_s23, 16, %s674_s25, [#allocation2] }
   0xc   :  { %660 = dma.done.wait [#allocation2], 16 }
   0xd   :  { %661 = vsyncadd [#allocation2], 4294967280 }
   0xe   :  { %17 = sfence }
   0xf   :  { %s713_s26 = smov 0   ;;  %s715_s27 = smov 0  }
  0x10   :  { %s717_s28 = smov 0  }
  0x11 LB: > { %s35_s0 = sadd.s32 1, %s668_s27  ;;  %p593_p5 = scmp.ge.s32.totalorder %s672_s28, 1  ;;  %s672_s28 = sphi %s717_s28, %s23_s28   ;;  %s668_s27 = sphi %s715_s27, %s766_s27   ;;  %s664_s26 = sphi %s713_s26, %s765_s26  }
  0x12   : > { %p37_p6 = scmp.ge.s32.totalorder %s35_s0, 2  ;;  %p253_p7 = scmp.lt.s32.totalorder %s672_s28, 3 }
  0x14   : > { %s768_s0 = smov (%p37_p6, %s35_s0), 0  ;;  %p254_p8 = pnand %p593_p5, %p253_p7 }
  0x15   : > { %p315_p9 = scmp.lt.s32.totalorder (!%p254_p8), %s664_s26, 1  ;;  %s361_s29 = sld [smem:[#allocation3]] (!%p254_p8) }
  0x16   : > { %257 = sbr.rel (%p254_p8) target bundleno = 43 (0x2b), region = 36  ;;  %s604_s30 = sld [smem:[#allocation3 + $0x1]] (!%p254_p8) }
  0x1b   : > { %v373_v0 = vlaneseq  ;;  %s770_s26 = smov (!%p315_p9, %s664_s26), 1  ;;  %v362_v4 = vstv %s361_s29 }
  0x1c   : > { %s594_s7 = sshll.u32 %s770_s26, 1  ;;  %s607_s14 = sshll.u32 %s770_s26, 3  ;;  %v366_v7 = vstv %s604_s30 }
  0x1d   : > { %v374_v1 = vshrl.u32 %v373_v0, 7  ;;  %s318_s10 = scalar_lea.vmem %s759_s1, %s594_s7  ;;  %s322_s13 = scalar_lea.vmem %s760_s2, %s594_s7 }
  0x1e   : > { %v359_v2 = vld [vmem:[%s318_s10] sm:$0x3]  ;;  %s331_s17 = scalar_lea.vmem %s761_s3, %s607_s14  ;;  %s340_s20 = scalar_lea.vmem %s762_s4, %s607_s14 }
  0x1f   : > { %v360_v3 = vld [vmem:[%s322_s13] sm:$0x3]  ;;  %vm363_vm0 = vcmp.lt.f32.partialorder %v359_v2, %v362_v4  ;;  %v375_v5 = vsub.s32 0, %v374_v1  ;;  %v379_v6 = vsub.s32 1, %v374_v1  ;;  %s349_s23 = scalar_lea.vmem %s763_s5, %s607_s14  ;;  %s358_s26 = scalar_lea.vmem %s764_s6, %s607_s14 }
  0x20   : > { %v364_v8 = vsel %vm363_vm0, %v360_v3, %v359_v2  ;;  %vm367_vm1 = vcmp.lt.f32.partialorder %v360_v3, %v366_v7  ;;  %v371_v14 = vld [vmem:[%s331_s17] sm:$0xff] }
  0x21   : > { %v369_v9 = vadd.f32 %v364_v8, %v359_v2  ;;  %v368_v10 = vsel %vm367_vm1, %v359_v2, %v360_v3  ;;  %v385_v18 = vld [vmem:[%s340_s20] sm:$0xff] }
  0x22   : > { %v370_v11 = vadd.f32 %v368_v10, %v360_v3 }
  0x23   : > { %v376_v12 = vrot.slane %v369_v9, %v375_v5  ;;  %v380_v13 = vrot.slane %v369_v9, %v379_v6 }
  0x24   : > { %v390_v15 = vrot.slane %v370_v11, %v375_v5  ;;  %v394_v16 = vrot.slane %v370_v11, %v379_v6 }
  0x25   : > { %v381_v17 = vcombine.low %v376_v12, %v380_v13 }
  0x26   : > { %v395_v19 = vcombine.low %v390_v15, %v394_v16 }
  0x27   : > { %v383_v20 = vmul.f32 %v381_v17, %v371_v14 }
  0x28   : > { %v397_v21 = vmul.f32 %v395_v19, %v385_v18 }
  0x29   : > { %384 = vst [vmem:[%s349_s23] sm:$0xff] %v383_v20 }
  0x2a   : > { %398 = vst [vmem:[%s358_s26] sm:$0xff] %v397_v21 }
  0x2b PF: > { %s23_s28 = sadd.s32 1, %s672_s28   ;;  %s765_s26 = smov %s668_s27 }
  0x2c   : > { %p20_p10 = scmp.ge.s32.totalorder %s23_s28, 4   ;;  %s766_s27 = smov %s768_s0 }
  0x2e   :  { %22 = sbr.rel (!%p20_p10) target bundleno = 17 (0x11), region = 87 }

// kernel: spatial_exchange.2
= control target key start
LH: loop header
LB: loop body
LE: loop exit
PB: predicated region body
PF: predicated region fallthrough
CT: control target
= control target key end

     0   :  { %s1102_s0 = inlined_call_operand.vmem [shape: f32[18], index: 0, kind: input, shape index: {}]   ;;  %s1103_s1 = inlined_call_operand.vmem [shape: f32[4,4,16,16], index: 1, kind: input, shape index: {}]   ;;  %s1104_s2 = inlined_call_operand.vmem [shape: f32[4,16,16], index: 2, kind: output, shape index: {}]  }
   0x1   :  { %s7_s11 = sshll.u32 %s1102_s0, 4  ;;  %s8_s11 = int_to_ptr.vmem [resolvable:$true] %s7_s11 }
   0x2   :  { %s740_s12 = scalar_lea.vmem %s8_s11, 16  ;;  %p745_p1 = scmp.lt.s32.totalorder %s8_s11, %s8_s11 }
   0x3   :  { %p741_p0 = scmp.ne.s32.totalorder %s8_s11, %s740_s12  ;;  %p746_p2 = scmp.lt.s32.totalorder %s740_s12, %s740_s12 }
   0x5   :  { %p747_p3 = por %p746_p2, %p745_p1 }
   0x7   :  { %p748_p4 = pnand %p747_p3, %p741_p0 }
   0x9   :  { %751 = shalt.err (!%p748_p4)  }
   0xa   :  { %s778_s13 = smov [#allocation5]  }
   0xb   :  { %10 = dma.vmem_to_smem %s8_s11, 16, %s778_s13, [#allocation4] }
   0xc   :  { %764 = dma.done.wait [#allocation4], 16 }
   0xd   :  { %765 = vsyncadd [#allocation4], 4294967280 }
   0xe   :  { %12 = sfence }
   0xf   :  { %s800_s14 = smov 0   ;;  %s802_s15 = smov 0  }
  0x10   :  { %s804_s16 = smov 0  }
  0x11 LB: > { %s30_s0 = sadd.s32 1, %s772_s15  ;;  %p676_p5 = scmp.ge.s32.totalorder %s776_s16, 1  ;;  %s776_s16 = sphi %s804_s16, %s18_s16   ;;  %s772_s15 = sphi %s802_s15, %s1106_s15   ;;  %s768_s14 = sphi %s800_s14, %s1105_s14  }
  0x12   : > { %p32_p6 = scmp.ge.s32.totalorder %s30_s0, 4  ;;  %p114_p7 = scmp.lt.s32.totalorder %s776_s16, 5 }
  0x14   : > { %s1108_s0 = smov (%p32_p6, %s30_s0), 0  ;;  %p115_p8 = pnand %p676_p5, %p114_p7 }
  0x15   : > { %p140_p9 = scmp.lt.s32.totalorder (!%p115_p8), %s768_s14, 3  ;;  %s779_s21 = smov (!%p115_p8), 1  }
  0x16   : > { %118 = sbr.rel (%p115_p8) target bundleno = 365 (0x16d), region = 24  ;;  %s683_s22 = sld [smem:[#allocation5 + $0xa]] (!%p115_p8) }
  0x17   : > { %s689_s23 = sld [smem:[#allocation5 + $0xd]] (!%p115_p8)  ;;  %s780_s5 = smov (!%p115_p8), 127  }
  0x18   : > { %s850_s24 = sld [smem:[#allocation5 + $0xb]] (!%p115_p8)  ;;  %s781_s10 = smov (!%p115_p8), 126  }
  0x19   : > { %s852_s25 = sld [smem:[#allocation5 + $0xe]] (!%p115_p8) }
  0x1a   : > { %s854_s26 = sld [smem:[#allocation5 + $0x10]] (!%p115_p8) }
  0x1b   : > { %s1110_s14 = smov (!%p140_p9, %s768_s14), 3  ;;  %vm163_vm0 = vcmask 130048   ;;  %vm225_vm1 = vcmask 1040384   ;;  %vm244_vm2 = vcmask 7168   ;;  %vm248_vm3 = vcmask 138240   ;;  %s856_s27 = sld [smem:[#allocation5 + $0x1]] }
  0x1c   : > { %s702_s17 = sshll.u32 %s1110_s14, 6  ;;  %v307_v53 = vstv %s683_s22  ;;  %s858_s28 = sld [smem:[#allocation5 + $0x2]]  ;;  %vm356_vm4 = vcmask 1046528   ;;  %vm475_vm5 = vcmask 1045504  }
  0x1d   : > { %s148_s20 = scalar_lea.vmem %s1103_s1, %s702_s17  ;;  %s861_s29 = sld [smem:[#allocation5 + $0x4]]  ;;  %v405_v56 = vstv %s689_s23 }
  0x1e   : > { %v155_v0 = vld [vmem:[%s148_s20] sm:$0xff]  ;;  %v157_v1 = vld [vmem:[%s148_s20 + $0x10] sm:$0xff]  ;;  %v156_v8 = vld [vmem:[%s148_s20 + $0x8] sm:$0xff]  ;;  %s866_s30 = sld [smem:[#allocation5 + $0x5]]  ;;  %v335_v59 = vstv %s850_s24  ;;  %s703_s17 = sshll.u32 %s1110_s14, 4 }
  0x1f   : > { %v159_v2 = vld [vmem:[%s148_s20 + $0x20] sm:$0xff]  ;;  %v161_v3 = vld [vmem:[%s148_s20 + $0x30] sm:$0xff]  ;;  %v165_v4 = vsel %vm163_vm0, %v157_v1, 0.0  ;;  %v178_v5 = vsel %vm163_vm0, %v155_v0, -inf  ;;  %v179_v6 = vsel %vm163_vm0, %v157_v1, -inf  ;;  %v164_v11 = vsel %vm163_vm0, %v155_v0, 0.0 }
  0x20   : > { %v180_v7 = vsel %vm163_vm0, %v159_v2, -inf  ;;  %v182_v10 = vsel %vm163_vm0, %v161_v3, -inf  ;;  %v158_v12 = vld [vmem:[%s148_s20 + $0x18] sm:$0xff]  ;;  %v160_v13 = vld [vmem:[%s148_s20 + $0x28] sm:$0xff]  ;;  %v171_v15 = vsel %vm163_vm0, %v156_v8, 0.0  ;;  %v185_v18 = vsel %vm163_vm0, %v156_v8, -inf }
  0x21   : > { %v181_v9 = vmax.f32 %v178_v5, %v180_v7  ;;  %v162_v14 = vld [vmem:[%s148_s20 + $0x38] sm:$0xff]  ;;  %v183_v16 = vmax.f32 %v179_v6, %v182_v10  ;;  %v172_v17 = vsel %vm163_vm0, %v158_v12, 0.0  ;;  %v186_v19 = vsel %vm163_vm0, %v158_v12, -inf  ;;  %s869_s3 = sld [smem:[#allocation5 + $0x7]]  ;;  %s154_s20 = scalar_lea.vmem %s1104_s2, %s703_s17 }
  0x22   : > { %v187_v20 = vsel %vm163_vm0, %v160_v13, -inf  ;;  %v189_v21 = vsel %vm163_vm0, %v162_v14, -inf  ;;  %v166_v22 = vadd.f32 %v165_v4, %v164_v11  ;;  %v167_v23 = vsel %vm163_vm0, %v159_v2, 0.0  ;;  %s872_s4 = sld [smem:[#allocation5 + $0x8]] }
  0x23   : > { %v184_v24 = vmax.f32 %v181_v9, %v183_v16  ;;  %v188_v25 = vmax.f32 %v185_v18, %v187_v20  ;;  %v190_v26 = vmax.f32 %v186_v19, %v189_v21  ;;  %v169_v27 = vsel %vm163_vm0, %v161_v3, 0.0  ;;  %s877_s6 = sld [smem:[#allocation5]] }
  0x24   : > { %v168_v28 = vadd.f32 %v167_v23, %v166_v22  ;;  %v173_v29 = vadd.f32 %v172_v17, %v171_v15  ;;  %v174_v30 = vsel %vm163_vm0, %v160_v13, 0.0  ;;  %v176_v32 = vsel %vm163_vm0, %v162_v14, 0.0  ;;  %s882_s7 = sld [smem:[#allocation5 + $0x9]] }
  0x25   : > { %198 = vst.msk [vmem:[#allocation3] sm:$0xff] %vm163_vm0, %v184_v24  ;;  %v191_v31 = vmax.f32 %v188_v25, %v190_v26  ;;  %s887_s8 = sld [smem:[#allocation5 + $0xc]]  ;;  %v447_v4 = vstv %s852_s25  ;;  %v891_v5 = vstv %s854_s26  ;;  %v293_v12 = vstv %s856_s27 }
  0x26   : > { %v170_v33 = vadd.f32 %v169_v27, %v168_v28  ;;  %v175_v34 = vadd.f32 %v174_v30, %v173_v29  ;;  %s893_s9 = sld [smem:[#allocation5 + $0xf]]  ;;  %v321_v13 = vstv %s858_s28  ;;  %v384_v14 = vstv %s861_s29 }
  0x27   : > { %199 = vst.msk [vmem:[#allocation3 + $0x8] sm:$0xff] %vm163_vm0, %v191_v31  ;;  %s899_s11 = sld [smem:[#allocation5 + $0x3]]  ;;  %v426_v20 = vstv %s866_s30  ;;  %v918_v21 = vstv %s869_s3 }
  0x28   : > { %196 = vst.msk [vmem:[#allocation2] sm:$0xff] %vm163_vm0, %v170_v33  ;;  %v177_v35 = vadd.f32 %v176_v32, %v175_v34  ;;  %s907_s12 = sld [smem:[#allocation5 + $0x6]]  ;;  %v921_v22 = vstv %s872_s4 }
  0x29   : > { %v281_v27 = vstv %s877_s6  ;;  %s697_s13 = sld [smem:[#allocation5 + $0x11]] }
  0x2a   : > { %197 = vst.msk [vmem:[#allocation2 + $0x8] sm:$0xff] %vm163_vm0, %v177_v35  ;;  %v287_v31 = vstv %s882_s7 }
  0x2b   : > { %v367_v35 = vstv %s887_s8 }
  0x2c   : > { %v252_v36 = vld [vmem:[#allocation3] sm:$0xff] }
  0x2d   : > { %v256_v37 = vrot.slane %v252_v36, 7 }
  0x2e   : > { %v253_v38 = vld [vmem:[#allocation3 + $0x8] sm:$0xff] }
  0x2f   : > { %v261_v39 = vsel %vm225_vm1, 0.0, %v256_v37  ;;  %v257_v40 = vrot.slane %v253_v38, 7  ;;  %v219_v41 = vld [vmem:[#allocation2] sm:$0xff] }
  0x30   : > { %265 = vrot.lane.b32.xlu1 %v261_v39, %s779_s21  ;;  %v221_v42 = vmul.f32 0.25, %v219_v41  ;;  %v946_v39 = vstv %s893_s9 }
  0x31   : > { %v258_v43 = vsel %vm225_vm1, %v256_v37, %v257_v40  ;;  %v220_v44 = vld [vmem:[#allocation2 + $0x8] sm:$0xff]  ;;  %v262_v49 = vsel %vm225_vm1, %v257_v40, 0.0 }
  0x32   : > { %v226_v45 = vrot.slane %v221_v42, 7  ;;  %v222_v46 = vmul.f32 0.25, %v220_v44 }
  0x34   : > { %267 = vrot.lane.b32.xlu1 %v258_v43, %s779_s21  ;;  %v231_v47 = vsel %vm225_vm1, 0.0, %v226_v45  ;;  %v227_v48 = vrot.slane %v222_v46, 7  ;;  %v349_v43 = vstv %s899_s11 }
  0x35   : > { %235 = vrot.lane.b32.xlu0 %v231_v47, %s779_s21  ;;  %v468_v47 = vstv %s907_s12 }
  0x36   : > { %v228_v50 = vsel %vm225_vm1, %v226_v45, %v227_v48  ;;  %v232_v51 = vsel %vm225_vm1, %v227_v48, 0.0 }
  0x38   : > { %269 = vrot.lane.b32.xlu1 %v262_v49, %s779_s21 }
  0x39   : > { %237 = vrot.lane.b32.xlu0 %v228_v50, %s779_s21 }
  0x3d   : > { %239 = vrot.lane.b32.xlu0 %v232_v51, %s779_s21 }
  0xa2   : > { %v266_v52 = vpop.permute.xlu1 %265 }
  0xa3   : > { %v274_v54 = vsel %vm244_vm2, 0.0, %v266_v52 }
  0xa4   : > { %v864_v55 = vsel %vm248_vm3, %v274_v54, 0.0 }
  0xa5   : > { %v308_v57 = vmul.f32 %v307_v53, %v864_v55  ;;  %v406_v62 = vmul.f32 %v405_v56, %v864_v55  ;;  %v336_v1 = vmul.f32 %v335_v59, %v864_v55  ;;  %v448_v29 = vmul.f32 %v447_v4, %v864_v55 }
  0xa6   : > { %v268_v58 = vpop.permute.xlu1 %267  ;;  %v953_v42 = vmul.f32 %v891_v5, %v864_v55  ;;  %v288_v46 = vmul.f32 %v287_v31, %v864_v55  ;;  %v368_v54 = vmul.f32 %v367_v35, %v864_v55 }
  0xa7   : > { %v275_v60 = vsel %vm244_vm2, 0.0, %v268_v58  ;;  %v236_v61 = vpop.permute.xlu0 %235  ;;  %312 = vrot.lane.b32.xlu0 %v308_v57, %s780_s5  ;;  %v412_v9 = vrot.slane %v406_v62, 1  ;;  %v454_v44 = vrot.slane %v448_v29, 1 }
  0xa8   : > { %v880_v63 = vsel %vm248_vm3, %v275_v60, 0.0  ;;  %v245_v6 = vsel %vm244_vm2, 0.0, %v236_v61  ;;  %v531_v60 = vrot.slane %v953_v42, 2 }
  0xa9   : > { %v309_v0 = vmul.f32 %v307_v53, %v880_v63  ;;  %v407_v2 = vmul.f32 %v405_v56, %v880_v63  ;;  %v337_v16 = vmul.f32 %v335_v59, %v880_v63  ;;  %v914_v19 = vsel %vm248_vm3, %v245_v6, 0.0 }
  0xaa   : > { %v270_v3 = vpop.permute.xlu1 %269  ;;  %v294_v25 = vmul.f32 %v293_v12, %v914_v19  ;;  %v449_v26 = vmul.f32 %v447_v4, %v880_v63  ;;  %v385_v33 = vmul.f32 %v384_v14, %v914_v19  ;;  %v427_v37 = vmul.f32 %v426_v20, %v914_v19 }
  0xab   : > { %v276_v7 = vsel %vm244_vm2, 0.0, %v270_v3  ;;  %v238_v8 = vpop.permute.xlu0 %237  ;;  %314 = vrot.lane.b32.xlu1 %v309_v0, %s780_s5  ;;  %340 = vrot.lane.b32.xlu0 %v336_v1, %s781_s10  ;;  %v413_v10 = vrot.slane %v407_v2, 1  ;;  %v322_v49 = vmul.f32 %v321_v13, %v914_v19  ;;  %v973_v59 = vmul.f32 %v891_v5, %v880_v63 }
  0xac   : > { %v902_v11 = vsel %vm248_vm3, %v276_v7, 0.0  ;;  %v246_v15 = vsel %vm244_vm2, 0.0, %v238_v8  ;;  %v455_v41 = vrot.slane %v449_v26, 1  ;;  %v391_v50 = vrot.slane %v385_v33, 1 }
  0xad   : > { %v414_v17 = vsel %vm356_vm4, %v412_v9, %v413_v10  ;;  %v408_v18 = vmul.f32 %v405_v56, %v902_v11  ;;  %v929_v28 = vsel %vm248_vm3, %v246_v15, 0.0  ;;  %v450_v30 = vmul.f32 %v447_v4, %v902_v11 }
  0xae   : > { %v937_v34 = vmul.f32 %v384_v14, %v929_v28  ;;  %v943_v38 = vmul.f32 %v426_v20, %v929_v28  ;;  %v295_v40 = vmul.f32 %v293_v12, %v929_v28  ;;  %v433_v52 = vrot.slane %v427_v37, 1 }
  0xaf   : > { %342 = vrot.lane.b32.xlu1 %v337_v16, %s781_s10  ;;  %417 = vrot.lane.b32.xlu0 %v414_v17, %s780_s5  ;;  %v240_v23 = vpop.permute.xlu0 %239  ;;  %v415_v24 = vrot.slane %v408_v18, 1  ;;  %v457_v45 = vrot.slane %v450_v30, 1  ;;  %v487_v56 = vmul.f32 %v946_v39, %v864_v55  ;;  %v456_v57 = vsel %vm356_vm4, %v454_v44, %v455_v41 }
  0xb0   : > { %v247_v36 = vsel %vm244_vm2, 0.0, %v240_v23  ;;  %v392_v51 = vrot.slane %v937_v34, 1  ;;  %v434_v53 = vrot.slane %v943_v38, 1  ;;  %v323_v58 = vmul.f32 %v321_v13, %v929_v28 }
  0xb1   : > { %v416_v32 = vsel %vm356_vm4, %v413_v10, %v415_v24  ;;  %v959_v48 = vsel %vm248_vm3, %v247_v36, 0.0  ;;  %v458_v61 = vsel %vm356_vm4, %v455_v41, %v457_v45  ;;  %v980_v0 = vmul.f32 %v918_v21, %v914_v19 }
  0xb2   : > { %v387_v62 = vmul.f32 %v384_v14, %v959_v48  ;;  %v282_v1 = vmul.f32 %v281_v27, %v914_v19  ;;  %v393_v2 = vsel %vm356_vm4, %v391_v50, %v392_v51  ;;  %v429_v3 = vmul.f32 %v426_v20, %v959_v48 }
  0xb3   : > { %419 = vrot.lane.b32.xlu1 %v416_v32, %s780_s5  ;;  %298 = vrot.lane.b32.xlu0 %v294_v25, %s780_s5  ;;  %v289_v4 = vmul.f32 %v287_v31, %v880_v63  ;;  %v283_v6 = vmul.f32 %v281_v27, %v929_v28  ;;  %v435_v7 = vsel %vm356_vm4, %v433_v52, %v434_v53  ;;  %v532_v12 = vrot.slane %v973_v59, 2 }
  0xb4   : > { %v992_v8 = vmul.f32 %v918_v21, %v929_v28  ;;  %v994_v9 = vadd.f32 %v288_v46, %v282_v1  ;;  %v350_v10 = vmul.f32 %v349_v43, %v914_v19  ;;  %v351_v14 = vmul.f32 %v349_v43, %v929_v28 }
  0xb5   : > { %v1000_v13 = vadd.f32 %v289_v4, %v283_v6  ;;  %v369_v15 = vmul.f32 %v367_v35, %v880_v63  ;;  %v394_v16 = vrot.slane %v387_v62, 1  ;;  %v374_v18 = vrot.slane %v368_v54, 1 }
  0xb6   : > { %v357_v17 = vrot.slane %v350_v10, 1  ;;  %v370_v20 = vmul.f32 %v367_v35, %v902_v11  ;;  %v358_v23 = vrot.slane %v351_v14, 1  ;;  %v352_v25 = vmul.f32 %v349_v43, %v959_v48 }
  0xb7   : > { %326 = vrot.lane.b32.xlu0 %v322_v49, %s781_s10  ;;  %300 = vrot.lane.b32.xlu1 %v295_v40, %s780_s5  ;;  %v375_v24 = vrot.slane %v369_v15, 1  ;;  %v469_v26 = vmul.f32 %v468_v47, %v914_v19  ;;  %v470_v29 = vmul.f32 %v468_v47, %v929_v28  ;;  %v488_v30 = vmul.f32 %v946_v39, %v880_v63 }
  0xb8   : > { %v377_v27 = vrot.slane %v370_v20, 1  ;;  %v493_v31 = vrot.slane %v487_v56, 2  ;;  %v1013_v32 = vsel %vm356_vm4, %v357_v17, %v358_v23  ;;  %v360_v34 = vrot.slane %v352_v25, 1 }
  0xb9   : > { %v1016_v33 = vsel %vm356_vm4, %v374_v18, %v375_v24  ;;  %v476_v35 = vrot.slane %v469_v26, 2  ;;  %v477_v37 = vrot.slane %v470_v29, 2  ;;  %v494_v40 = vrot.slane %v488_v30, 2 }
  0xba   : > { %v1019_v36 = vsel %vm356_vm4, %v375_v24, %v377_v27  ;;  %v471_v41 = vmul.f32 %v468_v47, %v959_v48  ;;  %v436_v42 = vrot.slane %v429_v3, 1  ;;  %v527_v43 = vmul.f32 %v891_v5, %v902_v11 }
  0xbb   : > { %459 = vrot.lane.b32.xlu0 %v456_v57, %s781_s10  ;;  %328 = vrot.lane.b32.xlu1 %v323_v58, %s781_s10  ;;  %v1025_v44 = vsel %vm356_vm4, %v358_v23, %v360_v34  ;;  %v489_v45 = vmul.f32 %v946_v39, %v902_v11  ;;  %v395_v46 = vsel %vm356_vm4, %v392_v51, %v394_v16  ;;  %v510_v39 = vrot.slane %v980_v0, 2 }
  0xbc   : > { %v1031_v49 = vsel %vm475_vm5, %v476_v35, %v477_v37  ;;  %v1034_v50 = vsel %vm475_vm5, %v493_v31, %v494_v40  ;;  %v479_v52 = vrot.slane %v471_v41, 2  ;;  %v533_v47 = vsel %vm475_vm5, %v531_v60, %v532_v12 }
  0xbd   : > { %v496_v5 = vrot.slane %v489_v45, 2  ;;  %v546_v51 = vmul.f32 %v921_v22, %v914_v19  ;;  %v547_v56 = vmul.f32 %v921_v22, %v929_v28  ;;  %v437_v58 = vsel %vm356_vm4, %v434_v53, %v436_v42 }
  0xbe   : > { %v1040_v54 = vsel %vm475_vm5, %v477_v37, %v479_v52  ;;  %v511_v59 = vrot.slane %v992_v8, 2  ;;  %v534_v60 = vrot.slane %v527_v43, 2  ;;  %v566_v19 = vstv %s697_s13 }
  0xbf   : > { %396 = vrot.lane.b32.xlu0 %v393_v2, %s780_s5  ;;  %461 = vrot.lane.b32.xlu1 %v458_v61, %s781_s10  ;;  %v1048_v57 = vsel %vm475_vm5, %v494_v40, %v496_v5  ;;  %v506_v61 = vmul.f32 %v918_v21, %v959_v48  ;;  %v552_v62 = vrot.slane %v546_v51, 2  ;;  %v553_v28 = vrot.slane %v547_v56, 2 }
  0xc0   : > { %v568_v0 = vmul.f32 %v566_v19, %v880_v63  ;;  %v512_v1 = vsel %vm475_vm5, %v510_v39, %v511_v59  ;;  %v535_v38 = vsel %vm475_vm5, %v532_v12, %v534_v60  ;;  %v548_v2 = vmul.f32 %v921_v22, %v959_v48 }
  0xc1   : > { %v513_v53 = vrot.slane %v506_v61, 2  ;;  %v567_v21 = vmul.f32 %v566_v19, %v864_v55  ;;  %v554_v4 = vsel %vm475_vm5, %v552_v62, %v553_v28 }
  0xc2   : > { %v574_v3 = vrot.slane %v568_v0, 2  ;;  %v555_v63 = vrot.slane %v548_v2, 2 }
  0xc3   : > { %438 = vrot.lane.b32.xlu0 %v435_v7, %s781_s10  ;;  %398 = vrot.lane.b32.xlu1 %v395_v46, %s780_s5  ;;  %v514_v6 = vsel %vm475_vm5, %v511_v59, %v513_v53  ;;  %v569_v7 = vmul.f32 %v566_v19, %v902_v11  ;;  %v573_v8 = vrot.slane %v567_v21, 2 }
  0xc4   : > { %v556_v48 = vsel %vm475_vm5, %v553_v28, %v555_v63 }
  0xc5   : > { %v575_v22 = vsel %vm475_vm5, %v573_v8, %v574_v3  ;;  %v576_v10 = vrot.slane %v569_v7, 2 }
  0xc7   : > { %536 = vrot.lane.b32.xlu0 %v533_v47, %s780_s5  ;;  %440 = vrot.lane.b32.xlu1 %v437_v58, %s781_s10  ;;  %v577_v55 = vsel %vm475_vm5, %v574_v3, %v576_v10 }
  0xcb   : > { %515 = vrot.lane.b32.xlu0 %v512_v1, %s780_s5  ;;  %538 = vrot.lane.b32.xlu1 %v535_v38, %s780_s5 }
  0xcf   : > { %557 = vrot.lane.b32.xlu0 %v554_v4, %s781_s10  ;;  %517 = vrot.lane.b32.xlu1 %v514_v6, %s780_s5 }
  0xd3   : > { %578 = vrot.lane.b32.xlu0 %v575_v22, %s781_s10  ;;  %559 = vrot.lane.b32.xlu1 %v556_v48, %s781_s10 }
  0xd7   : > { %580 = vrot.lane.b32.xlu1 %v577_v55, %s781_s10 }
 0x119   : > { %v313_v12 = vpop.permute.xlu0 %312 }
 0x11d   : > { %v315_v11 = vpop.permute.xlu1 %314  ;;  %v341_v14 = vpop.permute.xlu0 %340 }
 0x121   : > { %v343_v15 = vpop.permute.xlu1 %342  ;;  %v418_v16 = vpop.permute.xlu0 %417 }
 0x125   : > { %v420_v17 = vpop.permute.xlu1 %419  ;;  %v299_v18 = vpop.permute.xlu0 %298 }
 0x126   : > { %v304_v20 = vadd.f32 %v299_v18, %v994_v9 }
 0x128   : > { %v318_v23 = vadd.f32 %v313_v12, %v304_v20 }
 0x129   : > { %v301_v24 = vpop.permute.xlu1 %300  ;;  %v327_v25 = vpop.permute.xlu0 %326 }
 0x12a   : > { %v305_v26 = vadd.f32 %v301_v24, %v1000_v13  ;;  %v332_v27 = vadd.f32 %v327_v25, %v318_v23 }
 0x12c   : > { %v346_v29 = vadd.f32 %v341_v14, %v332_v27  ;;  %v319_v30 = vadd.f32 %v315_v11, %v305_v26 }
 0x12d   : > { %v329_v31 = vpop.permute.xlu1 %328  ;;  %v460_v34 = vpop.permute.xlu0 %459 }
 0x12e   : > { %v333_v35 = vadd.f32 %v329_v31, %v319_v30  ;;  %v364_v37 = vadd.f32 %v1013_v32, %v346_v29 }
 0x130   : > { %v347_v40 = vadd.f32 %v343_v15, %v333_v35  ;;  %v381_v41 = vadd.f32 %v1016_v33, %v364_v37 }
 0x131   : > { %v462_v42 = vpop.permute.xlu1 %461  ;;  %v397_v43 = vpop.permute.xlu0 %396 }
 0x132   : > { %v402_v45 = vadd.f32 %v397_v43, %v381_v41  ;;  %v365_v9 = vadd.f32 %v1025_v44, %v347_v40 }
 0x134   : > { %v382_v46 = vadd.f32 %v1019_v36, %v365_v9  ;;  %v423_v52 = vadd.f32 %v418_v16, %v402_v45 }
 0x135   : > { %v399_v13 = vpop.permute.xlu1 %398  ;;  %v439_v5 = vpop.permute.xlu0 %438 }
 0x136   : > { %v403_v47 = vadd.f32 %v399_v13, %v382_v46  ;;  %v444_v39 = vadd.f32 %v439_v5, %v423_v52 }
 0x138   : > { %v465_v51 = vadd.f32 %v460_v34, %v444_v39  ;;  %v424_v56 = vadd.f32 %v420_v17, %v403_v47 }
 0x139   : > { %v441_v58 = vpop.permute.xlu1 %440  ;;  %v537_v59 = vpop.permute.xlu0 %536 }
 0x13a   : > { %v445_v32 = vadd.f32 %v441_v58, %v424_v56  ;;  %v483_v60 = vadd.f32 %v1031_v49, %v465_v51 }
 0x13c   : > { %v466_v33 = vadd.f32 %v462_v42, %v445_v32  ;;  %v500_v61 = vadd.f32 %v1034_v50, %v483_v60 }
 0x13d   : > { %v539_v19 = vpop.permute.xlu1 %538  ;;  %v516_v62 = vpop.permute.xlu0 %515 }
 0x13e   : > { %v521_v44 = vadd.f32 %v516_v62, %v500_v61  ;;  %v484_v36 = vadd.f32 %v1040_v54, %v466_v33 }
 0x140   : > { %v501_v28 = vadd.f32 %v1048_v57, %v484_v36  ;;  %v542_v0 = vadd.f32 %v537_v59, %v521_v44 }
 0x141   : > { %v518_v1 = vpop.permute.xlu1 %517  ;;  %v558_v38 = vpop.permute.xlu0 %557 }
 0x142   : > { %v522_v53 = vadd.f32 %v518_v1, %v501_v28  ;;  %v563_v2 = vadd.f32 %v558_v38, %v542_v0 }
 0x144   : > { %v543_v21 = vadd.f32 %v539_v19, %v522_v53 }
 0x145   : > { %v560_v3 = vpop.permute.xlu1 %559  ;;  %v579_v4 = vpop.permute.xlu0 %578 }
 0x146   : > { %v584_v49 = vadd.f32 %v579_v4, %v563_v2  ;;  %v564_v6 = vadd.f32 %v560_v3, %v543_v21 }
 0x148   : > { %v698_v63 = vmul.f32 -1.442695, %v584_v49 }
 0x149   : > { %v581_v50 = vpop.permute.xlu1 %580 }
 0x14a   : > { %732 = vpow2.f32 %v698_v63  ;;  %v585_v7 = vadd.f32 %v581_v50, %v564_v6 }
 0x14c   : > { %v699_v8 = vmul.f32 -1.442695, %v585_v7 }
 0x14e   : > { %734 = vpow2.f32 %v699_v8 }
 0x157   : > { %v733_v54 = vpop.eup %732 }
 0x158   : > { %v592_v22 = vadd.f32 1.0, %v733_v54 }
 0x15a   : > { %736 = vrcp.f32 %v592_v22 }
 0x15b   : > { %v735_v57 = vpop.eup %734 }
 0x15c   : > { %v593_v48 = vadd.f32 1.0, %v735_v57 }
 0x15e   : > { %738 = vrcp.f32 %v593_v48 }
 0x167   : > { %v737_v10 = vpop.eup %736 }
 0x168   : > { %598 = vst.msk [vmem:[%s154_s20] sm:$0xff] %vm163_vm0, %v737_v10 }
 0x16b   : > { %v739_v55 = vpop.eup %738 }
 0x16c   : > { %599 = vst.msk [vmem:[%s154_s20 + $0x8] sm:$0xff] %vm163_vm0, %v739_v55 }
 0x16d PF: > { %s18_s16 = sadd.s32 1, %s776_s16   ;;  %s1105_s14 = smov %s772_s15 }
 0x16e   : > { %p15_p10 = scmp.ge.s32.totalorder %s18_s16, 6   ;;  %s1106_s15 = smov %s1108_s0 }
 0x170   :  { %17 = sbr.rel (!%p15_p10) target bundleno = 17 (0x11), region = 66 }

</bundles_post_ra>
